<compile_context>
chip_gen: v6e
topology: v6e:2x2x1
jax: 0.10.0
libtpu: 0.0.40
codegen_flags: <defaults>
</compile_context>

<pallas_src>
import functools

import jax
import jax.numpy as jnp
from jax.experimental import pallas as pl
from jax.experimental.pallas import tpu as pltpu


def _norm_pm1_kernel(x_ref, o_ref):
    # normalize_01_into_pm1: x.add(x).add_(-1)  ==  2*x - 1
    x = x_ref[...]
    o_ref[...] = x + x - jnp.asarray(1, dtype=x.dtype)


_LANE_CANDIDATES = (4096, 2048, 1024, 512, 256, 128)
_MIB = 1024 * 1024


def _round_up(x: int, m: int) -> int:
    return ((x + m - 1) // m) * m


@functools.lru_cache(maxsize=1)
def _tpu_generation() -> str:
    try:
        kind = jax.devices()[0].device_kind.lower()
    except Exception:
        return "unknown"
    if "v7" in kind:
        return "v7x"
    if "v6" in kind:
        return "v6e"
    if "v5" in kind:
        return "v5e"
    return "unknown"


def _target_tile_bytes(gen: str) -> int:
    # v7x: 3.2 TB/s HBM -> a 2 MiB block is ~1.3 us, so the ~0.35 us fixed
    #   per-grid-step overhead is ~25%; 8 MiB blocks amortize it (needs the
    #   explicit vmem_limit below since 4 x 8 MiB hits the 32 MiB scoped default).
    # v6e: 4 MiB (16 MiB resident) fits the 32 MiB scoped default with headroom.
    # v5e / unknown: stay at 2 MiB (8 MiB resident) under the 16 MiB default.
    return {"v7x": 8 * _MIB, "v6e": 4 * _MIB}.get(gen, 2 * _MIB)


def _pick_tile_rows(rows: int, lanes: int, itemsize: int, sublane: int, gen: str) -> int:
    if rows <= sublane:
        # Tiny-rows case: one full-array block avoids masked-sublane surprises.
        return rows
    target = _target_tile_bytes(gen)
    tile_rows = max(sublane, target // (lanes * itemsize))
    tile_rows = _round_up(tile_rows, sublane)
    tile_rows = min(tile_rows, _round_up(rows, sublane))
    # Balance the grid steps so there is no tiny trailing block.
    steps = pl.cdiv(rows, tile_rows)
    tile_rows = min(_round_up(pl.cdiv(rows, steps), sublane), tile_rows)
    # v7x megacore: make sure both TensorCores receive at least one grid step.
    if gen == "v7x" and pl.cdiv(rows, tile_rows) == 1 and rows >= 2 * sublane:
        tile_rows = _round_up(pl.cdiv(rows, 2), sublane)
    return tile_rows


def _launch_2d(x2d: jax.Array, tile_rows: int, lanes: int) -> jax.Array:
    rows = x2d.shape[0]
    dtype = x2d.dtype
    block_bytes = tile_rows * lanes * jnp.dtype(dtype).itemsize
    # in + out, each double-buffered, plus headroom; never below the v5e default.
    vmem_limit = max(16 * _MIB, 4 * block_bytes + 4 * _MIB)
    grid = (pl.cdiv(rows, tile_rows),)
    # NOTE: no input_output_aliases here -- aliasing only pays off when the
    # caller donates the buffer at a jit boundary; keeping it off keeps eager
    # callers (like the test below, which re-reads the input) safe.
    return pl.pallas_call(
        _norm_pm1_kernel,
        out_shape=jax.ShapeDtypeStruct((rows, lanes), dtype),
        grid_spec=pltpu.PrefetchScalarGridSpec(
            num_scalar_prefetch=0,
            grid=grid,
            in_specs=[pl.BlockSpec((tile_rows, lanes), lambda i: (i, 0))],
            out_specs=pl.BlockSpec((tile_rows, lanes), lambda i: (i, 0)),
        ),
        compiler_params=pltpu.CompilerParams(
            dimension_semantics=("parallel",),  # shards grid across TCs on v7x
            vmem_limit_bytes=int(vmem_limit),
        ),
    )(x2d)


def norm_transform(img: jax.Array) -> jax.Array:
    """Pallas TPU implementation of NormTransform.forward (elementwise 2*x - 1)."""
    orig_shape = img.shape
    dtype = img.dtype
    total = img.size

    if total == 0:
        return img
    if not jnp.issubdtype(dtype, jnp.floating):
        # TODO(synk): non-float inputs (uint8/bool) keep torch-style wraparound
        # semantics via plain jnp; the Pallas path is reserved for float images.
        return img + img - jnp.asarray(1, dtype=dtype)

    itemsize = jnp.dtype(dtype).itemsize
    # Sublane packing: 8 rows for 4-byte, 16 for 2-byte, 32 for 1-byte dtypes.
    sublane = max(8, 32 // itemsize)
    gen = _tpu_generation()

    # Widest lane-dense slab that divides the element count; tie-break toward a
    # candidate that also keeps rows a multiple of the sublane count so every
    # block is full and all stores are unmasked.
    divisors = [c for c in _LANE_CANDIDATES if total % c == 0]
    lanes = None
    for c in divisors:
        if (total // c) % sublane == 0:
            lanes = c
            break
    if lanes is None and divisors:
        lanes = divisors[0]

    if lanes is not None:
        rows = total // lanes
        tile_rows = _pick_tile_rows(rows, lanes, itemsize, sublane, gen)
        out = _launch_2d(img.reshape(rows, lanes), tile_rows, lanes)
        return out.reshape(orig_shape)

    # Ragged element count: run the kernel on the 128-aligned prefix only and
    # compute the (<128-element) tail in plain jnp, then stitch. No jnp.pad
    # pass and no full-size trailing slice.
    lanes = 128
    rows = total // lanes
    flat = img.reshape(-1)
    one = jnp.asarray(1, dtype=dtype)
    if rows == 0:
        # Fewer than 128 elements: not worth a kernel launch.
        return (flat + flat - one).reshape(orig_shape)
    prefix = flat[: rows * lanes].reshape(rows, lanes)
    tile_rows = _pick_tile_rows(rows, lanes, itemsize, sublane, gen)
    head = _launch_2d(prefix, tile_rows, lanes).reshape(-1)
    tail = flat[rows * lanes:]
    tail_out = tail + tail - one
    return jnp.concatenate([head, tail_out]).reshape(orig_shape)


if __name__ == "__main__":
    key = jax.random.PRNGKey(0)
    k1, k2 = jax.random.split(key)

    # Small NCHW image batch, values in [0, 1) like normalized image pixels.
    x = jax.random.uniform(k1, (2, 4, 16, 16), dtype=jnp.float32)
    y = jax.block_until_ready(norm_transform(x))
    ref = x + x - 1.0
    assert y.shape == x.shape and y.dtype == x.dtype
    assert jnp.max(jnp.abs(y - ref)) < 1e-6

    # Ragged element count (not a multiple of 128) exercises the prefix+tail path.
    x2 = jax.random.uniform(k2, (2, 3, 15, 15), dtype=jnp.float32)
    y2 = jax.block_until_ready(norm_transform(x2))
    ref2 = x2 + x2 - 1.0
    assert y2.shape == x2.shape and y2.dtype == x2.dtype
    assert jnp.max(jnp.abs(y2 - ref2)) < 1e-6

    print("KERNEL_OK")
</pallas_src>

<mosaic_0001>
module attributes {stable_mosaic.version = 11 : i64} {
  func.func @_norm_pm1_kernel(%arg0: i32, %arg1: memref<8x256xf32, #tpu.memory_space<vmem>>, %arg2: memref<8x256xf32, #tpu.memory_space<vmem>>) attributes {dimension_semantics = [#tpu.dimension_semantics<parallel>], iteration_bounds = array<i64: 1>, scalar_prefetch = 0 : i64, scratch_operands = 0 : i64, tpu.core_type = #tpu.core_type<tc>, window_params = [{transform_indices = @transform_0, window_bounds = array<i64: 8, 256>}, {transform_indices = @transform_1, window_bounds = array<i64: 8, 256>}]} {
    %c0 = arith.constant 0 : index
    %c0_0 = arith.constant 0 : index
    %0 = vector.load %arg1[%c0, %c0_0] : memref<8x256xf32, #tpu.memory_space<vmem>>, vector<8x256xf32>
    %1 = arith.addf %0, %0 : vector<8x256xf32>
    %cst = arith.constant 1.000000e+00 : f32
    %2 = vector.broadcast %cst : f32 to vector<8x256xf32>
    %3 = arith.subf %1, %2 : vector<8x256xf32>
    %c0_1 = arith.constant 0 : index
    %c0_2 = arith.constant 0 : index
    %4 = vector.load %arg2[%c0_1, %c0_2] : memref<8x256xf32, #tpu.memory_space<vmem>>, vector<8x256xf32>
    tpu.vector_store %arg2[%c0_1, %c0_2], %3 {strides = array<i32>} : memref<8x256xf32, #tpu.memory_space<vmem>>, vector<8x256xf32>,
    return
  }
  func.func @transform_0(%arg0: i32) -> (i32, i32) {
    %c0_i32 = arith.constant 0 : i32
    %c0_i32_0 = arith.constant 0 : i32
    return %arg0, %c0_i32 : i32, i32
  }
  func.func @transform_1(%arg0: i32) -> (i32, i32) {
    %c0_i32 = arith.constant 0 : i32
    %c0_i32_0 = arith.constant 0 : i32
    return %arg0, %c0_i32 : i32, i32
  }
}

</mosaic_0001>

<bundles_post_ra>
// kernel: tpu_custom_call.1
= control target key start
LH: loop header
LB: loop body
LE: loop exit
PB: predicated region body
PF: predicated region fallthrough
CT: control target
= control target key end

     0   :  { %6 = vsyncpa [#allocation3], 0  ;;  %s110_s0 = inlined_call_operand.hbm [shape: f32[8,256], index: 0, kind: input, shape index: {}]   ;;  %s111_s1 = inlined_call_operand.hbm [shape: f32[8,256], index: 1, kind: output, shape index: {}]  }
   0x1   :  { %7 = vsyncpa [#allocation4], 0  ;;  %s92_s6 = smov [#allocation2]  }
   0x2   :  { %s14_s7 = sshll.u32 %s92_s6, 4  ;;  %s15_s7 = int_to_ptr.vmem [resolvable:$true] %s14_s7 }
   0x3   :  { %s56_s8 = scalar_lea.vmem %s15_s7, 256  ;;  %p61_p1 = scmp.lt.s32.totalorder %s15_s7, %s15_s7 }
   0x4   :  { %p57_p0 = scmp.ne.s32.totalorder %s15_s7, %s56_s8  ;;  %p62_p2 = scmp.lt.s32.totalorder %s56_s8, %s56_s8 }
   0x6   :  { %p63_p3 = por %p62_p2, %p61_p1 }
   0x8   :  { %p64_p4 = pnand %p63_p3, %p57_p0 }
   0xa   :  { %67 = shalt.err (!%p64_p4)
}
   0xb   :  { %17 = dma.hbm_to_vmem [thread:$0]  %s110_s0, 256, %s15_s7, [#allocation3]  }
   0xc   :  { %88 = dma.done.wait [#allocation3], 256  }
   0xd   :  { %89 = vsyncadd [#allocation3], 4294967040  ;;  %v21_v0 = vld [vmem:[#allocation2] sm:$0xff]  ;;  %v22_v1 = vld [vmem:[#allocation2 + $0x8] sm:$0xff]  ;;  %s93_s11 = smov [#allocation5]  }
   0xe   :  { %s35_s12 = sshll.u32 %s93_s11, 4  ;;  %v23_v2 = vadd.f32 %v21_v0, %v21_v0  ;;  %v24_v3 = vadd.f32 %v22_v1, %v22_v1  ;;  %s36_s12 = int_to_ptr.vmem [resolvable:$true] %s35_s12 }
   0xf   :  { %s68_s13 = scalar_lea.vmem %s36_s12, 256  ;;  %p73_p6 = scmp.lt.s32.totalorder %s36_s12, %s36_s12 }
  0x10   :  { %v44_v4 = vadd.f32 -1.0, %v23_v2  ;;  %v45_v5 = vadd.f32 -1.0, %v24_v3  ;;  %p69_p5 = scmp.ne.s32.totalorder %s36_s12, %s68_s13  ;;  %p74_p7 = scmp.lt.s32.totalorder %s68_s13, %s68_s13 }
  0x12   :  { %27 = vst [vmem:[#allocation5] sm:$0xff] %v44_v4  ;;  %28 = vst [vmem:[#allocation5 + $0x8] sm:$0xff] %v45_v5  ;;  %p75_p8 = por %p74_p7, %p73_p6 }
  0x14   :  { %p76_p9 = pnand %p75_p8, %p69_p5 }
  0x16   :  { %79 = shalt.err (!%p76_p9)
}
  0x17   :  { %38 = dma.vmem_to_hbm [thread:$0]  %s36_s12, 256, %s111_s1, [#allocation4]  }
  0x18   :  { %90 = dma.done.wait [#allocation4], 256  }
  0x19   :  { %91 = vsyncadd [#allocation4], 4294967040 }
  0x1a   :  { %42 = vsyncpa [#allocation3], 1 }
  0x1b   :  { %43 = vsyncpa [#allocation4], 1 }

</bundles_post_ra>
